<compile_context>
chip_gen: v7x
topology: tpu7x:2x2x1
jax: 0.10.0
libtpu: 0.0.40
codegen_flags: <defaults>
</compile_context>

<pallas_src>
import functools

import jax
import jax.numpy as jnp
from jax.experimental import pallas as pl
from jax.experimental.pallas import tpu as pltpu

C_IN, C1, C2, C_OUT = 2, 32, 16, 1  # channel sizes of the mode-3 conv chain


def _round_up(x, m):
    return ((x + m - 1) // m) * m


def _eo_mode3_kernel(d_ref, v_ref, w1d_ref, w1v_ref, b1_ref,
                     w2_ref, b2_ref, w3_ref, b3_ref, o_ref):
    """One spatial tile: layer 1 on the VPU (broadcast FMA), layers 2/3 on MXU."""
    d = d_ref[...]                                                  # (1, TP)
    v = v_ref[...]                                                  # (1, TP)

    # c1: 2 -> 32.  Contraction dim is only 2, so two broadcast multiply-adds
    # on the VPU beat a padded MXU matmul and keep the MXU off the tail path.
    h1 = w1d_ref[...] * d + w1v_ref[...] * v + b1_ref[...]          # (32, TP)
    h1 = jnp.maximum(h1, 0.0)

    # c2: 32 -> 16 (MXU).
    h2 = jnp.dot(w2_ref[...], h1,
                 preferred_element_type=jnp.float32) + b2_ref[...]  # (16, TP)
    h2 = jnp.maximum(h2, 0.0)

    # c3: 16 -> 1 (MXU).
    z = jnp.dot(w3_ref[...], h2,
                preferred_element_type=jnp.float32) + b3_ref[...]   # (1, TP)

    # sigmoid: exp goes to the EUP slot; the divide only touches the single
    # (1, TP) output row, so it is negligible and numerically exact.
    o_ref[...] = 1.0 / (1.0 + jnp.exp(-z))


def init_params(key):
    """Deterministic synthetic init (PyTorch-Conv2d-style uniform bounds)."""
    def conv1x1(key, c_out, c_in):
        kw, kb = jax.random.split(key)
        bound = 1.0 / jnp.sqrt(float(c_in))
        w = jax.random.uniform(kw, (c_out, c_in), jnp.float32, -bound, bound)
        b = jax.random.uniform(kb, (c_out, 1), jnp.float32, -bound, bound)
        return w, b

    k1, k2, k3 = jax.random.split(key, 3)
    w1, b1 = conv1x1(k1, C1, C_IN)
    w2, b2 = conv1x1(k2, C2, C1)
    w3, b3 = conv1x1(k3, C_OUT, C2)
    return dict(w1=w1, b1=b1, w2=w2, b2=b2, w3=w3, b3=b3)


@functools.partial(jax.jit, static_argnames=("tile_p",))
def edge_occlusion_mode3(depth, visible, params, tile_p=2048):
    """depth, visible: NCHW float32 with C=1.  Returns sigmoid(conv chain), NCHW C=1."""
    N, _, H, W = depth.shape
    P = N * H * W

    # No concat/transpose glue: (N,1,H,W) -> (1,P) is a free row-major reshape,
    # so the kernel reads depth/visible straight from HBM (~12 B per pixel total).
    d = depth.reshape(1, P)
    v = visible.reshape(1, P)

    w1, b1 = params["w1"], params["b1"]
    w2, b2 = params["w2"], params["b2"]
    w3, b3 = params["w3"], params["b3"]
    w1d, w1v = w1[:, 0:1], w1[:, 1:2]          # the two columns of the 2->32 conv

    # Large lane-dense spatial tile (mem-bound); clamp for tiny inputs and keep
    # it a multiple of 128.  Partial tail block is handled by Pallas masking.
    tile = min(_round_up(tile_p, 128), _round_up(P, 128))
    grid = (pl.cdiv(P, tile),)

    flops = 2 * P * (C_IN * C1 + C1 * C2 + C2 * C_OUT)
    bytes_accessed = 4 * (3 * P + C1 * C_IN + C1 + C2 * C1 + C2 + C_OUT * C2 + C_OUT)

    out_flat = pl.pallas_call(
        _eo_mode3_kernel,
        out_shape=jax.ShapeDtypeStruct((C_OUT, P), jnp.float32),
        grid=grid,
        in_specs=[
            pl.BlockSpec((1, tile), lambda i: (0, i)),        # depth tile
            pl.BlockSpec((1, tile), lambda i: (0, i)),        # visible tile
            pl.BlockSpec((C1, 1), lambda i: (0, 0)),          # w1[:, 0]
            pl.BlockSpec((C1, 1), lambda i: (0, 0)),          # w1[:, 1]
            pl.BlockSpec((C1, 1), lambda i: (0, 0)),          # b1
            pl.BlockSpec((C2, C1), lambda i: (0, 0)),         # w2
            pl.BlockSpec((C2, 1), lambda i: (0, 0)),          # b2
            pl.BlockSpec((C_OUT, C2), lambda i: (0, 0)),      # w3
            pl.BlockSpec((C_OUT, 1), lambda i: (0, 0)),       # b3
        ],
        out_specs=pl.BlockSpec((C_OUT, tile), lambda i: (0, i)),
        compiler_params=pltpu.CompilerParams(
            dimension_semantics=("parallel",)),
        cost_estimate=pl.CostEstimate(
            flops=flops, transcendentals=P, bytes_accessed=bytes_accessed),
    )(d, v, w1d, w1v, b1, w2, b2, w3, b3)

    # (1, P) -> (N, 1, H, W) is a free reshape (same row-major element order).
    return out_flat.reshape(N, C_OUT, H, W)


def _reference_mode3(depth, visible, params):
    """Pure-JAX reference for correctness check (same math, no Pallas)."""
    N, _, H, W = depth.shape
    x = jnp.concatenate([depth, visible], axis=1)
    x = jnp.transpose(x, (1, 0, 2, 3)).reshape(C_IN, N * H * W)
    h1 = jnp.maximum(params["w1"] @ x + params["b1"], 0.0)
    h2 = jnp.maximum(params["w2"] @ h1 + params["b2"], 0.0)
    z = params["w3"] @ h2 + params["b3"]
    y = jax.nn.sigmoid(z).reshape(C_OUT, N, H, W)
    return jnp.transpose(y, (1, 0, 2, 3))


if __name__ == "__main__":
    key = jax.random.PRNGKey(0)
    k_param, k_d1, k_v1, k_d2, k_v2 = jax.random.split(key, 5)
    params = init_params(k_param)

    # Case 1: small canonical shape (tile clamps to exactly cover P).
    N, H, W = 2, 16, 16
    depth = jax.random.normal(k_d1, (N, 1, H, W), jnp.float32)
    visible = jax.random.normal(k_v1, (N, 1, H, W), jnp.float32)
    out = jax.block_until_ready(edge_occlusion_mode3(depth, visible, params))
    ref = _reference_mode3(depth, visible, params)
    assert out.shape == (N, C_OUT, H, W)
    assert jnp.allclose(out, ref, atol=1e-5, rtol=1e-5), "mismatch vs reference (case 1)"

    # Case 2: spatial size NOT a multiple of the tile — exercises the masked
    # tail block produced by the cdiv grid (P = 480, tile = 256, grid = 2).
    N2, H2, W2 = 2, 12, 20
    depth2 = jax.random.normal(k_d2, (N2, 1, H2, W2), jnp.float32)
    visible2 = jax.random.normal(k_v2, (N2, 1, H2, W2), jnp.float32)
    out2 = jax.block_until_ready(
        edge_occlusion_mode3(depth2, visible2, params, tile_p=256))
    ref2 = _reference_mode3(depth2, visible2, params)
    assert out2.shape == (N2, C_OUT, H2, W2)
    assert jnp.allclose(out2, ref2, atol=1e-5, rtol=1e-5), "mismatch vs reference (case 2)"

    print("KERNEL_OK")
</pallas_src>

<mosaic_0001>
module attributes {stable_mosaic.version = 11 : i64} {
  func.func @_eo_mode3_kernel(%arg0: i32, %arg1: memref<1x512xf32, #tpu.memory_space<vmem>>, %arg2: memref<1x512xf32, #tpu.memory_space<vmem>>, %arg3: memref<32x1xf32, #tpu.memory_space<vmem>>, %arg4: memref<32x1xf32, #tpu.memory_space<vmem>>, %arg5: memref<32x1xf32, #tpu.memory_space<vmem>>, %arg6: memref<16x32xf32, #tpu.memory_space<vmem>>, %arg7: memref<16x1xf32, #tpu.memory_space<vmem>>, %arg8: memref<1x16xf32, #tpu.memory_space<vmem>>, %arg9: memref<1x1xf32, #tpu.memory_space<vmem>>, %arg10: memref<1x512xf32, #tpu.memory_space<vmem>>) attributes {dimension_semantics = [#tpu.dimension_semantics<parallel>], iteration_bounds = array<i64: 1>, scalar_prefetch = 0 : i64, scratch_operands = 0 : i64, tpu.core_type = #tpu.core_type<tc>, window_params = [{transform_indices = @transform_0, window_bounds = array<i64: 1, 512>}, {transform_indices = @transform_1, window_bounds = array<i64: 1, 512>}, {pipeline_mode = #tpu.pipeline_mode<synchronous>, transform_indices = @transform_2, window_bounds = array<i64: 32, 1>}, {pipeline_mode = #tpu.pipeline_mode<synchronous>, transform_indices = @transform_3, window_bounds = array<i64: 32, 1>}, {pipeline_mode = #tpu.pipeline_mode<synchronous>, transform_indices = @transform_4, window_bounds = array<i64: 32, 1>}, {pipeline_mode = #tpu.pipeline_mode<synchronous>, transform_indices = @transform_5, window_bounds = array<i64: 16, 32>}, {pipeline_mode = #tpu.pipeline_mode<synchronous>, transform_indices = @transform_6, window_bounds = array<i64: 16, 1>}, {pipeline_mode = #tpu.pipeline_mode<synchronous>, transform_indices = @transform_7, window_bounds = array<i64: 1, 16>}, {pipeline_mode = #tpu.pipeline_mode<synchronous>, transform_indices = @transform_8, window_bounds = array<i64: 1, 1>}, {transform_indices = @transform_9, window_bounds = array<i64: 1, 512>}]} {
    %c0 = arith.constant 0 : index
    %c0_0 = arith.constant 0 : index
    %0 = vector.load %arg1[%c0, %c0_0] : memref<1x512xf32, #tpu.memory_space<vmem>>, vector<1x512xf32>
    %c0_1 = arith.constant 0 : index
    %c0_2 = arith.constant 0 : index
    %1 = vector.load %arg2[%c0_1, %c0_2] : memref<1x512xf32, #tpu.memory_space<vmem>>, vector<1x512xf32>
    %c0_3 = arith.constant 0 : index
    %c0_4 = arith.constant 0 : index
    %2 = vector.load %arg3[%c0_3, %c0_4] : memref<32x1xf32, #tpu.memory_space<vmem>>, vector<32x1xf32>
    %3 = vector.broadcast %2 : vector<32x1xf32> to vector<32x512xf32>
    %4 = vector.broadcast %0 : vector<1x512xf32> to vector<32x512xf32>
    %5 = arith.mulf %3, %4 : vector<32x512xf32>
    %c0_5 = arith.constant 0 : index
    %c0_6 = arith.constant 0 : index
    %6 = vector.load %arg4[%c0_5, %c0_6] : memref<32x1xf32, #tpu.memory_space<vmem>>, vector<32x1xf32>
    %7 = vector.broadcast %6 : vector<32x1xf32> to vector<32x512xf32>
    %8 = vector.broadcast %1 : vector<1x512xf32> to vector<32x512xf32>
    %9 = arith.mulf %7, %8 : vector<32x512xf32>
    %10 = arith.addf %5, %9 : vector<32x512xf32>
    %c0_7 = arith.constant 0 : index
    %c0_8 = arith.constant 0 : index
    %11 = vector.load %arg5[%c0_7, %c0_8] : memref<32x1xf32, #tpu.memory_space<vmem>>, vector<32x1xf32>
    %12 = vector.broadcast %11 : vector<32x1xf32> to vector<32x512xf32>
    %13 = arith.addf %10, %12 : vector<32x512xf32>
    %cst = arith.constant 0.000000e+00 : f32
    %14 = vector.broadcast %cst : f32 to vector<32x512xf32>
    %15 = arith.maximumf %13, %14 : vector<32x512xf32>
    %c0_9 = arith.constant 0 : index
    %c0_10 = arith.constant 0 : index
    %16 = vector.load %arg6[%c0_9, %c0_10] : memref<16x32xf32, #tpu.memory_space<vmem>>, vector<16x32xf32>
    %cst_11 = arith.constant dense<0.000000e+00> : vector<16x512xf32>
    %17 = tpu.matmul %16, %15, %cst_11 {dimension_numbers = #tpu.dot_dimension_numbers<[1], [0], [0], [1], [0, 0, 1, 1], [], []>} : vector<16x32xf32>, vector<32x512xf32>, vector<16x512xf32> -> vector<16x512xf32>
    %c0_12 = arith.constant 0 : index
    %c0_13 = arith.constant 0 : index
    %18 = vector.load %arg7[%c0_12, %c0_13] : memref<16x1xf32, #tpu.memory_space<vmem>>, vector<16x1xf32>
    %19 = vector.broadcast %18 : vector<16x1xf32> to vector<16x512xf32>
    %20 = arith.addf %17, %19 : vector<16x512xf32>
    %cst_14 = arith.constant 0.000000e+00 : f32
    %21 = vector.broadcast %cst_14 : f32 to vector<16x512xf32>
    %22 = arith.maximumf %20, %21 : vector<16x512xf32>
    %c0_15 = arith.constant 0 : index
    %c0_16 = arith.constant 0 : index
    %23 = vector.load %arg8[%c0_15, %c0_16] : memref<1x16xf32, #tpu.memory_space<vmem>>, vector<1x16xf32>
    %cst_17 = arith.constant dense<0.000000e+00> : vector<1x512xf32>
    %24 = tpu.matmul %23, %22, %cst_17 {dimension_numbers = #tpu.dot_dimension_numbers<[1], [0], [0], [1], [0, 0, 1, 1], [], []>} : vector<1x16xf32>, vector<16x512xf32>, vector<1x512xf32> -> vector<1x512xf32>
    %c0_18 = arith.constant 0 : index
    %c0_19 = arith.constant 0 : index
    %25 = vector.load %arg9[%c0_18, %c0_19] : memref<1x1xf32, #tpu.memory_space<vmem>>, vector<1x1xf32>
    %26 = vector.broadcast %25 : vector<1x1xf32> to vector<1x512xf32>
    %27 = arith.addf %24, %26 : vector<1x512xf32>
    %cst_20 = arith.constant 0.000000e+00 : f32
    %28 = vector.broadcast %cst_20 : f32 to vector<1x512xf32>
    %29 = arith.subf %28, %27 : vector<1x512xf32>
    %30 = math.exp %29 : vector<1x512xf32>
    %cst_21 = arith.constant 1.000000e+00 : f32
    %31 = vector.broadcast %cst_21 : f32 to vector<1x512xf32>
    %32 = arith.addf %31, %30 : vector<1x512xf32>
    %cst_22 = arith.constant 1.000000e+00 : f32
    %33 = vector.broadcast %cst_22 : f32 to vector<1x512xf32>
    %34 = arith.divf %33, %32 : vector<1x512xf32>
    %c0_23 = arith.constant 0 : index
    %c0_24 = arith.constant 0 : index
    %35 = vector.load %arg10[%c0_23, %c0_24] : memref<1x512xf32, #tpu.memory_space<vmem>>, vector<1x512xf32>
    tpu.vector_store %arg10[%c0_23, %c0_24], %34 {strides = array<i32>} : memref<1x512xf32, #tpu.memory_space<vmem>>, vector<1x512xf32>,
    return
  }
  func.func @transform_0(%arg0: i32) -> (i32, i32) {
    %c0_i32 = arith.constant 0 : i32
    %c0_i32_0 = arith.constant 0 : i32
    return %c0_i32, %arg0 : i32, i32
  }
  func.func @transform_1(%arg0: i32) -> (i32, i32) {
    %c0_i32 = arith.constant 0 : i32
    %c0_i32_0 = arith.constant 0 : i32
    return %c0_i32, %arg0 : i32, i32
  }
  func.func @transform_2(%arg0: i32) -> (i32, i32) {
    %c0_i32 = arith.constant 0 : i32
    %c0_i32_0 = arith.constant 0 : i32
    %c0_i32_1 = arith.constant 0 : i32
    return %c0_i32, %c0_i32_0 : i32, i32
  }
  func.func @transform_3(%arg0: i32) -> (i32, i32) {
    %c0_i32 = arith.constant 0 : i32
    %c0_i32_0 = arith.constant 0 : i32
    %c0_i32_1 = arith.constant 0 : i32
    return %c0_i32, %c0_i32_0 : i32, i32
  }
  func.func @transform_4(%arg0: i32) -> (i32, i32) {
    %c0_i32 = arith.constant 0 : i32
    %c0_i32_0 = arith.constant 0 : i32
    %c0_i32_1 = arith.constant 0 : i32
    return %c0_i32, %c0_i32_0 : i32, i32
  }
  func.func @transform_5(%arg0: i32) -> (i32, i32) {
    %c0_i32 = arith.constant 0 : i32
    %c0_i32_0 = arith.constant 0 : i32
    %c0_i32_1 = arith.constant 0 : i32
    return %c0_i32, %c0_i32_0 : i32, i32
  }
  func.func @transform_6(%arg0: i32) -> (i32, i32) {
    %c0_i32 = arith.constant 0 : i32
    %c0_i32_0 = arith.constant 0 : i32
    %c0_i32_1 = arith.constant 0 : i32
    return %c0_i32, %c0_i32_0 : i32, i32
  }
  func.func @transform_7(%arg0: i32) -> (i32, i32) {
    %c0_i32 = arith.constant 0 : i32
    %c0_i32_0 = arith.constant 0 : i32
    %c0_i32_1 = arith.constant 0 : i32
    return %c0_i32, %c0_i32_0 : i32, i32
  }
  func.func @transform_8(%arg0: i32) -> (i32, i32) {
    %c0_i32 = arith.constant 0 : i32
    %c0_i32_0 = arith.constant 0 : i32
    %c0_i32_1 = arith.constant 0 : i32
    return %c0_i32, %c0_i32_0 : i32, i32
  }
  func.func @transform_9(%arg0: i32) -> (i32, i32) {
    %c0_i32 = arith.constant 0 : i32
    %c0_i32_0 = arith.constant 0 : i32
    return %c0_i32, %arg0 : i32, i32
  }
}

</mosaic_0001>

<bundles_post_ra>
// kernel: edge_occlusion_mode3.1
= control target key start
LH: loop header
LB: loop body
LE: loop exit
PB: predicated region body
PF: predicated region fallthrough
CT: control target
= control target key end

     0   :  { %v683_v0 = vmov 0   ;;  %v684_v17 = vmov 0.0   ;;  %v61_v18 = vlaneseq  ;;  %vm244_vm0 = vcmask 261120   ;;  %s819_s3 = inlined_call_operand.vmem [shape: f32[32,1], index: 3, kind: input, shape index: {}]   ;;  %s820_s2 = inlined_call_operand.vmem [shape: f32[32,1], index: 2, kind: input, shape index: {}]   ;;  %s821_s8 = inlined_call_operand.<no memory space> [shape: f32[1,1], index: 8, kind: input, shape index: {}]   ;;  %s822_s4 = inlined_call_operand.vmem [shape: f32[32,1], index: 4, kind: input, shape index: {}]   ;;  %s823_s6 = inlined_call_operand.vmem [shape: f32[16,1], index: 6, kind: input, shape index: {}]   ;;  %s824_s1 = inlined_call_operand.vmem [shape: f32[1,512], index: 1, kind: input, shape index: {}]   ;;  %s825_s0 = inlined_call_operand.vmem [shape: f32[1,512], index: 0, kind: input, shape index: {}]   ;;  %s826_s5 = inlined_call_operand.vmem [shape: f32[16,32], index: 5, kind: input, shape index: {}]   ;;  %s827_s7 = inlined_call_operand.vmem [shape: f32[1,16], index: 7, kind: input, shape index: {}]   ;;  %s828_s9 = inlined_call_operand.vmem [shape: f32[1,512], index: 9, kind: output, shape index: {}]  }
   0x1   :  { %666 = vset.pattern.permute.xlu1 %v683_v0  ;;  %665 = vset.pattern.permute.xlu0 %v683_v0  ;;  %v97_v1 = vld [vmem:[%s819_s3] sm:$0xff]  ;;  %v14_v3 = vstv %s821_s8  ;;  %v98_v4 = vld [vmem:[%s819_s3 + $0x8] sm:$0xff]  ;;  %v39_v6 = vld [vmem:[%s820_s2 + $0x18] sm:$0xff]  ;;  %vm424_vm1 = vcmask 130048  }
   0x2   :  { %v36_v2 = vld [vmem:[%s820_s2] sm:$0xff]  ;;  %103 = vperm.xlu1 %666, %v97_v1   ;;  %15 = vst [vmem:[#allocation2] sm:$0x1] %v14_v3  ;;  %v37_v5 = vld [vmem:[%s820_s2 + $0x8] sm:$0xff]  ;;  %v38_v7 = vld [vmem:[%s820_s2 + $0x10] sm:$0xff]  ;;  %315 = vmatprep.mubr.f32.mxu0 %v684_v17  ;;  %v784_v19 = vshrl.u32 %v61_v18, 7 }
   0x3   :  { %42 = vperm.xlu0 %665, %v36_v2   ;;  %v100_v8 = vld [vmem:[%s819_s3 + $0x18] sm:$0xff]  ;;  %v99_v9 = vld [vmem:[%s819_s3 + $0x10] sm:$0xff]  ;;  %v175_v10 = vld [vmem:[%s822_s4 + $0x8] sm:$0xff]  ;;  %392 = vmatprep.mubr.f32.mxu1 %v684_v17  ;;  %vm625_vm2 = vcmp.lt.s32.totalorder %v61_v18, 512 }
   0x4   :  { %v174_v11 = vld [vmem:[%s822_s4] sm:$0xff]  ;;  %v177_v12 = vld [vmem:[%s822_s4 + $0x18] sm:$0xff]  ;;  %v176_v13 = vld [vmem:[%s822_s4 + $0x10] sm:$0xff]  ;;  %v787_v20 = vsub.s32 0, %v784_v19  ;;  %v67_v21 = vsub.s32 1, %v784_v19  ;;  %v71_v22 = vsub.s32 2, %v784_v19 }
   0x5   :  { %v233_v14 = vld [vmem:[%s823_s6 + $0x8] sm:$0xff]  ;;  %v232_v15 = vld [vmem:[%s823_s6] sm:$0xff]  ;;  %v75_v23 = vsub.s32 3, %v784_v19 }
   0x6   :  { %108 = vperm.xlu1 %666, %v98_v4   ;;  %v35_v24 = vld [vmem:[%s824_s1] sm:$0xf] }
   0x7   :  { %47 = vperm.xlu0 %665, %v37_v5   ;;  %v34_v25 = vld [vmem:[%s825_s0] sm:$0xf]  ;;  %v125_v26 = vrot.slane %v35_v24, %v787_v20  ;;  %v129_v27 = vrot.slane %v35_v24, %v67_v21  ;;  %v133_v28 = vrot.slane %v35_v24, %v71_v22  ;;  %v137_v29 = vrot.slane %v35_v24, %v75_v23 }
   0x8   :  { %v64_v32 = vrot.slane %v34_v25, %v787_v20  ;;  %v68_v33 = vrot.slane %v34_v25, %v67_v21  ;;  %v72_v34 = vrot.slane %v34_v25, %v71_v22  ;;  %v76_v35 = vrot.slane %v34_v25, %v75_v23 }
   0x9   :  { %v414_v16 = vld [vmem:[#allocation2] sm:$0x1] }
   0xa   :  { %57 = vperm.xlu1 %666, %v39_v6  }
   0xb   :  { %52 = vperm.xlu0 %665, %v38_v7  }
   0xe   :  { %118 = vperm.xlu1 %666, %v100_v8  }
   0xf   :  { %113 = vperm.xlu0 %665, %v99_v9  }
  0x12   :  { %185 = vperm.xlu1 %666, %v175_v10  }
  0x13   :  { %180 = vperm.xlu0 %665, %v174_v11  }
  0x16   :  { %195 = vperm.xlu1 %666, %v177_v12  }
  0x17   :  { %190 = vperm.xlu0 %665, %v176_v13  }
  0x1a   :  { %241 = vperm.xlu1 %666, %v233_v14  }
  0x1b   :  { %236 = vperm.xlu0 %665, %v232_v15  }
  0x1f   :  { %417 = vperm.xlu0 %665, %v414_v16  }
  0x81   :  { %v104_v30 = vpop.permute.xlu1 %103 }
  0x82   :  { %v43_v31 = vpop.permute.xlu0 %42  ;;  %v142_v36 = vmul.f32 %v125_v26, %v104_v30  ;;  %v143_v37 = vmul.f32 %v129_v27, %v104_v30  ;;  %v144_v38 = vmul.f32 %v133_v28, %v104_v30  ;;  %v145_v39 = vmul.f32 %v137_v29, %v104_v30 }
  0x83   :  { %v81_v40 = vmul.f32 %v64_v32, %v43_v31  ;;  %v82_v41 = vmul.f32 %v68_v33, %v43_v31  ;;  %v83_v42 = vmul.f32 %v72_v34, %v43_v31  ;;  %v84_v43 = vmul.f32 %v76_v35, %v43_v31 }
  0x85   :  { %v109_v44 = vpop.permute.xlu1 %108  ;;  %v159_v56 = vadd.f32 %v143_v37, %v82_v41  ;;  %v161_v57 = vadd.f32 %v145_v39, %v84_v43  ;;  %v158_v58 = vadd.f32 %v142_v36, %v81_v40  ;;  %v160_v59 = vadd.f32 %v144_v38, %v83_v42 }
  0x86   :  { %v48_v45 = vpop.permute.xlu0 %47  ;;  %v146_v46 = vmul.f32 %v125_v26, %v109_v44  ;;  %v147_v47 = vmul.f32 %v129_v27, %v109_v44  ;;  %v148_v48 = vmul.f32 %v133_v28, %v109_v44  ;;  %v149_v49 = vmul.f32 %v137_v29, %v109_v44 }
  0x87   :  { %v85_v50 = vmul.f32 %v64_v32, %v48_v45  ;;  %v86_v51 = vmul.f32 %v68_v33, %v48_v45  ;;  %v87_v52 = vmul.f32 %v72_v34, %v48_v45  ;;  %v88_v53 = vmul.f32 %v76_v35, %v48_v45 }
  0x89   :  { %v58_v54 = vpop.permute.xlu1 %57  ;;  %v163_v60 = vadd.f32 %v147_v47, %v86_v51  ;;  %v165_v61 = vadd.f32 %v149_v49, %v88_v53  ;;  %v162_v62 = vadd.f32 %v146_v46, %v85_v50  ;;  %v164_v63 = vadd.f32 %v148_v48, %v87_v52 }
  0x8a   :  { %v53_v55 = vpop.permute.xlu0 %52  ;;  %v93_v0 = vmul.f32 %v64_v32, %v58_v54  ;;  %v94_v1 = vmul.f32 %v68_v33, %v58_v54  ;;  %v95_v2 = vmul.f32 %v72_v34, %v58_v54  ;;  %v96_v3 = vmul.f32 %v76_v35, %v58_v54 }
  0x8b   :  { %v89_v4 = vmul.f32 %v64_v32, %v53_v55  ;;  %v90_v5 = vmul.f32 %v68_v33, %v53_v55  ;;  %v91_v6 = vmul.f32 %v72_v34, %v53_v55  ;;  %v92_v7 = vmul.f32 %v76_v35, %v53_v55 }
  0x8d   :  { %v119_v8 = vpop.permute.xlu1 %118 }
  0x8e   :  { %v114_v9 = vpop.permute.xlu0 %113  ;;  %v154_v10 = vmul.f32 %v125_v26, %v119_v8  ;;  %v155_v11 = vmul.f32 %v129_v27, %v119_v8  ;;  %v156_v12 = vmul.f32 %v133_v28, %v119_v8  ;;  %v157_v13 = vmul.f32 %v137_v29, %v119_v8 }
  0x8f   :  { %v150_v14 = vmul.f32 %v125_v26, %v114_v9  ;;  %v151_v15 = vmul.f32 %v129_v27, %v114_v9  ;;  %v152_v16 = vmul.f32 %v133_v28, %v114_v9  ;;  %v153_v21 = vmul.f32 %v137_v29, %v114_v9 }
  0x90   :  { %v170_v22 = vadd.f32 %v154_v10, %v93_v0  ;;  %v171_v23 = vadd.f32 %v155_v11, %v94_v1  ;;  %v172_v24 = vadd.f32 %v156_v12, %v95_v2  ;;  %v173_v25 = vadd.f32 %v157_v13, %v96_v3  ;;  %v230_v10 = vld [vmem:[%s826_s5] sm:$0xff]  ;;  %v231_v11 = vld [vmem:[%s826_s5 + $0x8] sm:$0xff] }
  0x91   :  { %v186_v30 = vpop.permute.xlu1 %185  ;;  %v166_v32 = vadd.f32 %v150_v14, %v89_v4  ;;  %v167_v33 = vadd.f32 %v151_v15, %v90_v5  ;;  %v168_v34 = vadd.f32 %v152_v16, %v91_v6  ;;  %v169_v35 = vadd.f32 %v153_v21, %v92_v7 }
  0x92   :  { %v181_v31 = vpop.permute.xlu0 %180  ;;  %v203_v37 = vadd.f32 %v186_v30, %v163_v60  ;;  %v205_v39 = vadd.f32 %v186_v30, %v165_v61  ;;  %v202_v41 = vadd.f32 %v186_v30, %v162_v62  ;;  %v204_v27 = vadd.f32 %v186_v30, %v164_v63 }
  0x93   :  { %v199_v36 = vadd.f32 %v181_v31, %v159_v56  ;;  %v201_v38 = vadd.f32 %v181_v31, %v161_v57  ;;  %v198_v40 = vadd.f32 %v181_v31, %v158_v58  ;;  %v200_v26 = vadd.f32 %v181_v31, %v160_v59 }
  0x94   :  { %v219_v29 = vmax.f32 %v203_v37, 0.0  ;;  %v221_v43 = vmax.f32 %v205_v39, 0.0  ;;  %v218_v47 = vmax.f32 %v202_v41, 0.0  ;;  %v220_v49 = vmax.f32 %v204_v27, 0.0 }
  0x95   :  { %v215_v28 = vmax.f32 %v199_v36, 0.0  ;;  %v217_v42 = vmax.f32 %v201_v38, 0.0  ;;  %v196_v44 = vpop.permute.xlu1 %195  ;;  %v214_v46 = vmax.f32 %v198_v40, 0.0  ;;  %v216_v48 = vmax.f32 %v200_v26, 0.0 }
  0x96   :  { %v191_v45 = vpop.permute.xlu0 %190  ;;  %v210_v50 = vadd.f32 %v196_v44, %v170_v22  ;;  %v211_v51 = vadd.f32 %v196_v44, %v171_v23  ;;  %v212_v52 = vadd.f32 %v196_v44, %v172_v24  ;;  %v213_v53 = vadd.f32 %v196_v44, %v173_v25 }
  0x97   :  { %v206_v54 = vadd.f32 %v191_v45, %v166_v32  ;;  %v207_v55 = vadd.f32 %v191_v45, %v167_v33  ;;  %v208_v56 = vadd.f32 %v191_v45, %v168_v34  ;;  %v209_v57 = vadd.f32 %v191_v45, %v169_v35  ;;  %v413_v45 = vld [vmem:[%s827_s7] sm:$0x1] }
  0x98   :  { %v638_v58 = vpack.c.bf16 %v219_v29, %v215_v28  ;;  %v646_v59 = vpack.c.bf16 %v221_v43, %v217_v42  ;;  %v640_v60 = vpack.c.bf16 %v218_v47, %v214_v46  ;;  %v648_v61 = vpack.c.bf16 %v220_v49, %v216_v48 }
  0x99   :  { %v223_v62 = vmax.f32 %v207_v55, 0.0  ;;  %v227_v63 = vmax.f32 %v211_v51, 0.0  ;;  %v225_v0 = vmax.f32 %v209_v57, 0.0  ;;  %v229_v1 = vmax.f32 %v213_v53, 0.0  ;;  %v242_v21 = vpop.permute.xlu1 %241 }
  0x9a   :  { %639 = vmatprep.subr.bf16.mxu0 %v638_v58  ;;  %647 = vmatprep.subr.bf16.mxu1 %v646_v59  ;;  %v222_v2 = vmax.f32 %v206_v54, 0.0  ;;  %v226_v3 = vmax.f32 %v210_v50, 0.0  ;;  %v224_v4 = vmax.f32 %v208_v56, 0.0  ;;  %v228_v5 = vmax.f32 %v212_v52, 0.0  ;;  %v237_v16 = vpop.permute.xlu0 %236 }
  0x9b   :  { %641 = vmatpush1.bf16.msra.mxu0 %v640_v60  ;;  %649 = vmatpush1.bf16.msra.mxu1 %v648_v61  ;;  %v642_v6 = vpack.c.bf16 %v227_v63, %v223_v62  ;;  %v650_v7 = vpack.c.bf16 %v229_v1, %v225_v0 }
  0x9c   :  { %v644_v8 = vpack.c.bf16 %v226_v3, %v222_v2  ;;  %v652_v9 = vpack.c.bf16 %v228_v5, %v224_v4 }
  0x9d   :  { %643 = vmatprep.subr.bf16.mxu0 %v642_v6  ;;  %651 = vmatprep.subr.bf16.mxu1 %v650_v7  ;;  %v685_v7 = vmov 1966171168  }
  0x9e   :  { %v418_v46 = vpop.permute.xlu0 %417 }
  0x9f   :  { %645 = vmatpush1.bf16.msra.mxu0 %v644_v8  ;;  %653 = vmatpush1.bf16.msra.mxu1 %v652_v9  ;;  %v423_v47 = vrot.slane %v418_v46, %v787_v20  ;;  %v601_v8 = vunpack.c.l.s4 %v685_v7 }
  0xa1   :  { %v602_v9 = vunpack.c.0.s8 %v601_v8 }
  0xa2   :  { %632 = vmatmul.mubr.msk.f32.vlgmr.msra.gmra.mrb[0].mxu0 %vm244_vm0, %v230_v10  ;;  %634 = vmatmul.mubr.msk.f32.vlgmr.msra.gmra.mrb[0].mxu1 %vm244_vm0, %v230_v10 }
  0xa3   :  { %321 = vmatprep.mubr.f32.mxu0 %v684_v17  ;;  %398 = vmatprep.mubr.f32.mxu1 %v684_v17 }
  0xa6   :  { %633 = vmatmul.mubr.msk.f32.gmra.mrb[2].mxu0 %vm244_vm0, %v231_v11  ;;  %635 = vmatmul.mubr.msk.f32.gmra.mrb[2].mxu1 %vm244_vm0, %v231_v11 }
  0xa7   :  { %492 = vmatprep.mubr.f32.mxu0 %v684_v17  ;;  %563 = vmatprep.mubr.f32.mxu1 %v684_v17 }
 0x175   :  { %v317_v12 = vpop.f32.mrb[0].mxu0  ;;  %v394_v13 = vpop.f32.mrb[0].mxu1 }
 0x176   :  { %v319_v14 = vpop.f32.mrb[1].mxu0  ;;  %v396_v15 = vpop.f32.mrb[1].mxu1  ;;  %v318_v22 = vadd.f32 %v317_v12, %v237_v16  ;;  %v395_v23 = vadd.f32 %v394_v13, %v237_v16  ;;  %v605_v12 = vsub.s32 %v602_v9, %v784_v19 }
 0x177   :  { %v320_v24 = vadd.f32 %v319_v14, %v237_v16  ;;  %v397_v25 = vadd.f32 %v396_v15, %v237_v16 }
 0x178   :  { %v405_v38 = vmax.f32 %v318_v22, 0.0  ;;  %v407_v17 = vmax.f32 %v395_v23, 0.0 }
 0x179   :  { %v323_v30 = vpop.f32.mrb[2].mxu0  ;;  %v400_v31 = vpop.f32.mrb[2].mxu1  ;;  %v406_v41 = vmax.f32 %v320_v24, 0.0  ;;  %v408_v26 = vmax.f32 %v397_v25, 0.0 }
 0x17a   :  { %v324_v32 = vadd.f32 %v323_v30, %v242_v21  ;;  %v401_v33 = vadd.f32 %v400_v31, %v242_v21  ;;  %v325_v34 = vpop.f32.mrb[3].mxu0  ;;  %v402_v35 = vpop.f32.mrb[3].mxu1 }
 0x17b   :  { %v326_v36 = vadd.f32 %v325_v34, %v242_v21  ;;  %v403_v37 = vadd.f32 %v402_v35, %v242_v21 }
 0x17c   :  { %v409_v39 = vmax.f32 %v324_v32, 0.0  ;;  %v411_v40 = vmax.f32 %v401_v33, 0.0 }
 0x17d   :  { %v410_v27 = vmax.f32 %v326_v36, 0.0  ;;  %v412_v28 = vmax.f32 %v403_v37, 0.0 }
 0x17e   :  { %v656_v29 = vpack.c.bf16 %v409_v39, %v405_v38  ;;  %v660_v42 = vpack.c.bf16 %v411_v40, %v407_v17 }
 0x17f   :  { %v654_v43 = vpack.c.bf16 %v410_v27, %v406_v41  ;;  %v658_v44 = vpack.c.bf16 %v412_v28, %v408_v26 }
 0x181   :  { %655 = vmatprep.subr.bf16.mxu0 %v654_v43  ;;  %659 = vmatprep.subr.bf16.mxu1 %v658_v44 }
 0x182   :  { %657 = vmatpush1.bf16.msra.mxu0 %v656_v29  ;;  %661 = vmatpush1.bf16.msra.mxu1 %v660_v42 }
 0x185   :  { %636 = vmatmul.mubr.msk.f32.vlgmr.msra.gmra.mrb[4].mxu0 %vm424_vm1, %v413_v45  ;;  %637 = vmatmul.mubr.msk.f32.vlgmr.msra.gmra.mrb[4].mxu1 %vm424_vm1, %v413_v45 }
 0x258   :  { %v494_v48 = vpop.f32.mrb[4].mxu0  ;;  %v565_v49 = vpop.f32.mrb[4].mxu1 }
 0x259   :  { %v495_v50 = vadd.f32 %v494_v48, %v423_v47  ;;  %v566_v51 = vadd.f32 %v565_v49, %v423_v47  ;;  %v496_v52 = vpop.f32.mrb[5].mxu0  ;;  %v567_v53 = vpop.f32.mrb[5].mxu1 }
 0x25a   :  { %v497_v54 = vadd.f32 %v496_v52, %v423_v47  ;;  %v568_v55 = vadd.f32 %v567_v53, %v423_v47 }
 0x25b   :  { %v570_v56 = vsub.f32 0.0, %v495_v50  ;;  %v572_v57 = vsub.f32 0.0, %v566_v51 }
 0x25c   :  { %v571_v58 = vsub.f32 0.0, %v497_v54  ;;  %v573_v59 = vsub.f32 0.0, %v568_v55 }
 0x25d   :  { %v574_v60 = vmul.f32 1.442695, %v570_v56  ;;  %v578_v61 = vmul.f32 1.442695, %v572_v57 }
 0x25e   :  { %v576_v62 = vmul.f32 1.442695, %v571_v58  ;;  %v580_v63 = vmul.f32 1.442695, %v573_v59 }
 0x25f   :  { %667 = vpow2.f32 %v574_v60 }
 0x260   :  { %669 = vpow2.f32 %v578_v61 }
 0x261   :  { %671 = vpow2.f32 %v576_v62 }
 0x262   :  { %673 = vpow2.f32 %v580_v63 }
 0x269   :  { %v668_v20 = vpop.eup %667 }
 0x26a   :  { %v670_v0 = vpop.eup %669  ;;  %v582_v1 = vadd.f32 1.0, %v668_v20 }
 0x26b   :  { %v672_v2 = vpop.eup %671  ;;  %v584_v3 = vadd.f32 1.0, %v670_v0 }
 0x26c   :  { %v674_v4 = vpop.eup %673  ;;  %675 = vrcp.f32 %v582_v1  ;;  %v583_v5 = vadd.f32 1.0, %v672_v2 }
 0x26d   :  { %677 = vrcp.f32 %v584_v3  ;;  %v585_v6 = vadd.f32 1.0, %v674_v4 }
 0x26e   :  { %679 = vrcp.f32 %v583_v5 }
 0x26f   :  { %681 = vrcp.f32 %v585_v6 }
 0x276   :  { %v676_v10 = vpop.eup %675 }
 0x277   :  { %v678_v11 = vpop.eup %677 }
 0x278   :  { %v680_v13 = vpop.eup %679 }
 0x279   :  { %v682_v14 = vpop.eup %681  ;;  %v598_v15 = vcombine.low %v676_v10, %v680_v13 }
 0x27a   :  { %v599_v16 = vcombine.low %v678_v11, %v682_v14 }
 0x27b   :  { %v606_v21 = vrot.slane %v598_v15, %v605_v12 }
 0x27c   :  { %v613_v22 = vrot.slane %v599_v16, %v605_v12 }
 0x27e   :  { %v614_v23 = vcombine.low %v606_v21, %v613_v22 }
 0x280   :  { %v621_v24 = vrot.slane %v614_v23, %v605_v12 }
 0x282   :  { %627 = vst.msk [vmem:[%s828_s9] sm:$0xf] %vm625_vm2, %v621_v24 }

</bundles_post_ra>
